<compile_context>
chip_gen: v7x
topology: tpu7x:2x2x1
jax: 0.10.0
libtpu: 0.0.40
codegen_flags: <defaults>
</compile_context>

<pallas_src>
import functools

import jax
import jax.numpy as jnp
from jax.experimental import pallas as pl
from jax.experimental.pallas import tpu as pltpu

BN_EPS = 1e-5
LANE = 128
SUBLANE = 8


def _round_up(x, m):
    return ((x + m - 1) // m) * m


# ----------------------------------------------------------------------------
# Pallas kernels
# ----------------------------------------------------------------------------
def _phase1_kernel(x_ref, pack_ref, o_ref, *, latent_dim):
    """Phase 1: Linear(latent_dim -> out_dim).  K = latent_dim is tiny, so the
    contraction is an unrolled outer-product FMA on the VPU (no MXU push/pop).

    pack_ref rows [0:latent_dim] = weight rows, row [latent_dim] = bias.
    Output is stored at its true width (out_dim), f32 end-to-end.
    """
    xv = x_ref[...]                                        # (TB, latent)
    # Hoisted per-tile loads (JAX does not CSE broadcast_in_dim).
    w_rows = [pack_ref[k:k + 1, :] for k in range(latent_dim)]
    bias = pack_ref[latent_dim:latent_dim + 1, :]          # (1, out_dim)

    acc = bias
    for k in range(latent_dim):                            # unrolled, K=2
        acc = acc + xv[:, k:k + 1] * w_rows[k]
    o_ref[...] = acc


def _phase23_kernel(x_ref, pack_ref, w2_ref, w3_ref, o_ref, *,
                    latent_dim, h1p, h2p, out_w):
    """Phases 2/3: [Linear + BN(folded) + Dropout(eval=id) + ReLU] x2 + Linear.

    BatchNorm is pre-folded into the Linear weights/biases on the host, so the
    body is: VPU outer-product layer (K=latent), two bf16 MXU matmuls with f32
    accumulation, folded biases, ReLU.  Output stored at true width (out_w).

    pack_ref rows: [0:latent] = folded w1 rows, [latent]=b1', [latent+1]=b2',
    [latent+2]=b3 (all f32, zero-padded to the pack width).
    """
    xv = x_ref[...]                                        # (TB, latent)

    # Hoisted per-tile parameter loads.
    w1_rows = [pack_ref[k:k + 1, :h1p] for k in range(latent_dim)]
    b1 = pack_ref[latent_dim:latent_dim + 1, :h1p]
    b2 = pack_ref[latent_dim + 1:latent_dim + 2, :h2p]
    b3 = pack_ref[latent_dim + 2:latent_dim + 3, :out_w]

    # Layer 1: K = latent_dim (=2) -> VPU FMA over h1p (=64) lanes, no MXU.
    h = b1
    for k in range(latent_dim):
        h = h + xv[:, k:k + 1] * w1_rows[k]
    h = jnp.maximum(h, 0.0)

    # Layer 2: bf16 MXU matmul (K = h1p = 64), f32 acc, folded bias, ReLU.
    h = jnp.dot(h.astype(jnp.bfloat16), w2_ref[...],
                preferred_element_type=jnp.float32)
    h = jnp.maximum(h + b2, 0.0)

    # Output head: bf16 MXU matmul (K = h2p) + bias, true-width store.
    o_ref[...] = (
        jnp.dot(h.astype(jnp.bfloat16), w3_ref[...],
                preferred_element_type=jnp.float32)
        + b3
    )


# ----------------------------------------------------------------------------
# Host-side parameter preparation: BN folding + padding + packing
# ----------------------------------------------------------------------------
def prepare_params(raw, *, latent_dim, n_features, num_classes):
    out_dim = n_features * num_classes
    h1 = raw["w1"].shape[1]
    h2 = raw["w2"].shape[1]
    H1 = _round_up(h1, SUBLANE)   # layer-2 K dim: sublane-align only (64 -> 64)
    H2 = _round_up(h2, LANE)      # layer-2 N / layer-3 K: lane-align (128)
    wmax = max(H1, H2, out_dim)

    def pad2(a, rows, cols, dtype=jnp.float32):
        p = jnp.pad(a, ((0, rows - a.shape[0]), (0, cols - a.shape[1])))
        return p.astype(dtype)

    # Phase 1: pack [weight rows ; bias] at true output width.
    p1_pack = jnp.concatenate([raw["p1_w"], raw["p1_b"]], axis=0)

    # Phases 2/3: fold BatchNorm (running stats) into the Linear layers.
    s1 = raw["g1"] * jax.lax.rsqrt(raw["v1"] + BN_EPS)
    w1f = raw["w1"] * s1
    b1f = (raw["b1"] - raw["m1"]) * s1 + raw["be1"]
    s2 = raw["g2"] * jax.lax.rsqrt(raw["v2"] + BN_EPS)
    w2f = raw["w2"] * s2
    b2f = (raw["b2"] - raw["m2"]) * s2 + raw["be2"]

    p23_pack = jnp.concatenate(
        [pad2(w1f, latent_dim, wmax), pad2(b1f, 1, wmax),
         pad2(b2f, 1, wmax), pad2(raw["b3"], 1, wmax)], axis=0)
    # MXU operands stored as bf16 (f32 accumulation in-kernel).
    w2p = pad2(w2f, H1, H2, jnp.bfloat16)          # (64, 128)
    w3p = pad2(raw["w3"], H2, out_dim, jnp.bfloat16)   # (128, 48): K-pad only

    return dict(p1_pack=p1_pack, p23_pack=p23_pack, w2p=w2p, w3p=w3p,
                H1=H1, H2=H2, out_dim=out_dim)


# ----------------------------------------------------------------------------
# Wrapper
# ----------------------------------------------------------------------------
def ubp_forward(prep, x, *, phase, n_features, num_classes, batch_tile=2048):
    """Forward pass of UBPModel. Returns (B, n_features, num_classes)."""
    B, latent_dim = x.shape
    out_dim = prep["out_dim"]

    # Batch tile: large (default 2048) to amortize the ~0.35 us per-grid-step
    # overhead, clamped to the (padded) batch, multiple of 8 sublanes.
    Bp = _round_up(B, SUBLANE)
    TB = max(SUBLANE, min(_round_up(batch_tile, SUBLANE), Bp))
    # Keep at least 2 grid steps when the batch allows it so v7x's two
    # TensorCores both get work under dimension_semantics=("parallel",).
    if Bp // TB < 2 and Bp >= 2 * SUBLANE:
        TB = _round_up((Bp + 1) // 2, SUBLANE)
    B_pad = _round_up(B, TB)
    if B_pad != B:
        x = jnp.pad(x, ((0, B_pad - B), (0, 0)))
    grid = (B_pad // TB,)

    # VMEM per step at TB=2048: x tile pads to (TB,128) f32 = 1 MiB, out tile
    # TB*out_dim*4 ~= 0.4 MiB, double-buffered + small resident weights -> ~3
    # MiB, inside every generation's default scoped limit (incl. v5e 16 MiB).
    cparams = pltpu.CompilerParams(dimension_semantics=("parallel",))
    out_shape = jax.ShapeDtypeStruct((B_pad, out_dim), jnp.float32)

    if phase == 1:
        kernel = functools.partial(_phase1_kernel, latent_dim=latent_dim)
        pack = prep["p1_pack"]
        out = pl.pallas_call(
            kernel,
            out_shape=out_shape,
            grid=grid,
            in_specs=[
                pl.BlockSpec((TB, latent_dim), lambda i: (i, 0)),
                pl.BlockSpec(pack.shape, lambda i: (0, 0)),   # VMEM-resident
            ],
            out_specs=pl.BlockSpec((TB, out_dim), lambda i: (i, 0)),
            compiler_params=cparams,
        )(x, pack)
    else:  # phases 2 and 3 share the same decoder graph
        kernel = functools.partial(
            _phase23_kernel, latent_dim=latent_dim,
            h1p=prep["H1"], h2p=prep["H2"], out_w=out_dim)
        pack, w2p, w3p = prep["p23_pack"], prep["w2p"], prep["w3p"]
        out = pl.pallas_call(
            kernel,
            out_shape=out_shape,
            grid=grid,
            in_specs=[
                pl.BlockSpec((TB, latent_dim), lambda i: (i, 0)),
                pl.BlockSpec(pack.shape, lambda i: (0, 0)),   # VMEM-resident
                pl.BlockSpec(w2p.shape, lambda i: (0, 0)),    # VMEM-resident
                pl.BlockSpec(w3p.shape, lambda i: (0, 0)),    # VMEM-resident
            ],
            out_specs=pl.BlockSpec((TB, out_dim), lambda i: (i, 0)),
            compiler_params=cparams,
        )(x, pack, w2p, w3p)

    return out[:B].reshape(B, n_features, num_classes)


# ----------------------------------------------------------------------------
# Deterministic raw-parameter init (synthetic — not a checkpoint load)
# ----------------------------------------------------------------------------
def init_params(key, *, latent_dim, hidden_layer_sizes, n_features, num_classes):
    if hidden_layer_sizes[0] > hidden_layer_sizes[-1]:
        hidden_layer_sizes = list(reversed(hidden_layer_sizes))
    h1, h2 = hidden_layer_sizes
    out_dim = n_features * num_classes
    keys = jax.random.split(key, 16)
    f32 = jnp.float32

    def lin(kw, kb, din, dout):
        scale = 1.0 / jnp.sqrt(din)
        w = jax.random.uniform(kw, (din, dout), f32, -scale, scale)
        b = jax.random.uniform(kb, (1, dout), f32, -scale, scale)
        return w, b

    p1_w, p1_b = lin(keys[0], keys[1], latent_dim, out_dim)
    w1, b1 = lin(keys[2], keys[3], latent_dim, h1)
    w2, b2 = lin(keys[4], keys[5], h1, h2)
    w3, b3 = lin(keys[6], keys[7], h2, out_dim)

    def bn(kg, kb, km, kv, dim):
        g = 1.0 + 0.1 * jax.random.normal(kg, (1, dim), f32)
        be = 0.1 * jax.random.normal(kb, (1, dim), f32)
        m = 0.1 * jax.random.normal(km, (1, dim), f32)
        v = 1.0 + 0.1 * jax.random.uniform(kv, (1, dim), f32)
        return g, be, m, v

    g1, be1, m1, v1 = bn(keys[8], keys[9], keys[10], keys[11], h1)
    g2, be2, m2, v2 = bn(keys[12], keys[13], keys[14], keys[15], h2)

    return dict(
        p1_w=p1_w, p1_b=p1_b,
        w1=w1, b1=b1, g1=g1, be1=be1, m1=m1, v1=v1,
        w2=w2, b2=b2, g2=g2, be2=be2, m2=m2, v2=v2,
        w3=w3, b3=b3,
    )


# ----------------------------------------------------------------------------
# Pure-JAX reference (raw, unfolded params, all f32)
# ----------------------------------------------------------------------------
def ubp_reference(params, x, *, phase, n_features, num_classes):
    if phase == 1:
        out = x @ params["p1_w"] + params["p1_b"]
    else:
        h = x @ params["w1"] + params["b1"]
        h = (h - params["m1"]) / jnp.sqrt(params["v1"] + BN_EPS) * params["g1"] + params["be1"]
        h = jnp.maximum(h, 0.0)
        h = h @ params["w2"] + params["b2"]
        h = (h - params["m2"]) / jnp.sqrt(params["v2"] + BN_EPS) * params["g2"] + params["be2"]
        h = jnp.maximum(h, 0.0)
        out = h @ params["w3"] + params["b3"]
    return out.reshape(-1, n_features, num_classes)


# ----------------------------------------------------------------------------
if __name__ == "__main__":
    n_features = 16
    num_classes = 3
    latent_dim = 2
    hidden_layer_sizes = [128, 64]   # module reverses -> [64, 128]

    key = jax.random.PRNGKey(0)
    k_params, k_x = jax.random.split(key)
    params = init_params(
        k_params,
        latent_dim=latent_dim,
        hidden_layer_sizes=hidden_layer_sizes,
        n_features=n_features,
        num_classes=num_classes,
    )
    prep = prepare_params(
        params, latent_dim=latent_dim,
        n_features=n_features, num_classes=num_classes,
    )

    # (batch, batch_tile): default big tile, a ragged batch with grid>1, and a
    # multi-step grid.
    for batch, tile in ((8, 2048), (13, 8), (64, 16)):
        x = jax.random.normal(jax.random.fold_in(k_x, batch),
                              (batch, latent_dim), jnp.float32)
        for phase in (1, 2, 3):
            out = jax.block_until_ready(
                ubp_forward(prep, x, phase=phase,
                            n_features=n_features, num_classes=num_classes,
                            batch_tile=tile))
            expected = ubp_reference(params, x, phase=phase,
                                     n_features=n_features,
                                     num_classes=num_classes)
            assert out.shape == (batch, n_features, num_classes), (
                f"bad shape batch={batch} tile={tile} phase={phase}: {out.shape}")
            # Phase 1 is exact f32 (VPU only); phases 2/3 use bf16 MXU
            # operands with f32 accumulation -> looser tolerance.
            tol = 1e-4 if phase == 1 else 5e-2
            max_err = float(jnp.max(jnp.abs(out - expected)))
            assert jnp.allclose(out, expected, atol=tol, rtol=tol), (
                f"mismatch batch={batch} tile={tile} phase={phase} "
                f"max_abs_err={max_err:.3e}")

    print("KERNEL_OK")
</pallas_src>

<mosaic_0001>
module attributes {stable_mosaic.version = 11 : i64} {
  func.func @_phase1_kernel(%arg0: i32, %arg1: memref<8x2xf32, #tpu.memory_space<vmem>>, %arg2: memref<3x48xf32, #tpu.memory_space<vmem>>, %arg3: memref<8x48xf32, #tpu.memory_space<vmem>>) attributes {dimension_semantics = [#tpu.dimension_semantics<parallel>], iteration_bounds = array<i64: 1>, scalar_prefetch = 0 : i64, scratch_operands = 0 : i64, tpu.core_type = #tpu.core_type<tc>, window_params = [{transform_indices = @transform_0, window_bounds = array<i64: 8, 2>}, {pipeline_mode = #tpu.pipeline_mode<synchronous>, transform_indices = @transform_1, window_bounds = array<i64: 3, 48>}, {transform_indices = @transform_2, window_bounds = array<i64: 8, 48>}]} {
    %c0 = arith.constant 0 : index
    %c0_0 = arith.constant 0 : index
    %0 = vector.load %arg1[%c0, %c0_0] : memref<8x2xf32, #tpu.memory_space<vmem>>, vector<8x2xf32>
    %c0_1 = arith.constant 0 : index
    %c0_2 = arith.constant 0 : index
    %1 = vector.load %arg2[%c0_1, %c0_2] : memref<3x48xf32, #tpu.memory_space<vmem>>, vector<1x48xf32>
    %c1 = arith.constant 1 : index
    %c0_3 = arith.constant 0 : index
    %2 = vector.load %arg2[%c1, %c0_3] : memref<3x48xf32, #tpu.memory_space<vmem>>, vector<1x48xf32>
    %c2 = arith.constant 2 : index
    %c0_4 = arith.constant 0 : index
    %3 = vector.load %arg2[%c2, %c0_4] : memref<3x48xf32, #tpu.memory_space<vmem>>, vector<1x48xf32>
    %4 = vector.extract_strided_slice %0 {offsets = [0, 0], sizes = [8, 1], strides = [1, 1]} : vector<8x2xf32> to vector<8x1xf32>
    %5 = vector.broadcast %4 : vector<8x1xf32> to vector<8x48xf32>
    %6 = vector.broadcast %1 : vector<1x48xf32> to vector<8x48xf32>
    %7 = arith.mulf %5, %6 : vector<8x48xf32>
    %8 = vector.broadcast %3 : vector<1x48xf32> to vector<8x48xf32>
    %9 = arith.addf %8, %7 : vector<8x48xf32>
    %10 = vector.extract_strided_slice %0 {offsets = [0, 1], sizes = [8, 1], strides = [1, 1]} : vector<8x2xf32> to vector<8x1xf32>
    %11 = vector.broadcast %10 : vector<8x1xf32> to vector<8x48xf32>
    %12 = vector.broadcast %2 : vector<1x48xf32> to vector<8x48xf32>
    %13 = arith.mulf %11, %12 : vector<8x48xf32>
    %14 = arith.addf %9, %13 : vector<8x48xf32>
    %c0_5 = arith.constant 0 : index
    %c0_6 = arith.constant 0 : index
    %15 = vector.load %arg3[%c0_5, %c0_6] : memref<8x48xf32, #tpu.memory_space<vmem>>, vector<8x48xf32>
    tpu.vector_store %arg3[%c0_5, %c0_6], %14 {strides = array<i32>} : memref<8x48xf32, #tpu.memory_space<vmem>>, vector<8x48xf32>,
    return
  }
  func.func @transform_0(%arg0: i32) -> (i32, i32) {
    %c0_i32 = arith.constant 0 : i32
    %c0_i32_0 = arith.constant 0 : i32
    return %arg0, %c0_i32 : i32, i32
  }
  func.func @transform_1(%arg0: i32) -> (i32, i32) {
    %c0_i32 = arith.constant 0 : i32
    %c0_i32_0 = arith.constant 0 : i32
    %c0_i32_1 = arith.constant 0 : i32
    return %c0_i32, %c0_i32_0 : i32, i32
  }
  func.func @transform_2(%arg0: i32) -> (i32, i32) {
    %c0_i32 = arith.constant 0 : i32
    %c0_i32_0 = arith.constant 0 : i32
    return %arg0, %c0_i32 : i32, i32
  }
}

</mosaic_0001>

<bundles_post_ra>
// kernel: tpu_custom_call.1
= control target key start
LH: loop header
LB: loop body
LE: loop exit
PB: predicated region body
PF: predicated region fallthrough
CT: control target
= control target key end

     0   :  { %v89_v1 = vmov 0   ;;  %s131_s0 = inlined_call_operand.vmem [shape: f32[8,2], index: 0, kind: input, shape index: {}]   ;;  %s132_s1 = inlined_call_operand.vmem [shape: f32[3,48], index: 1, kind: input, shape index: {}]   ;;  %s133_s2 = inlined_call_operand.hbm [shape: f32[8,48], index: 2, kind: output, shape index: {}]  }
   0x1   :  { %v12_v0 = vld [vmem:[%s131_s0] sm:$0xff]  ;;  %63 = vset.pattern.permute.xlu0 %v89_v1 }
   0x2   :  { %7 = vsyncpa [#allocation3], 0  ;;  %18 = vperm.xlu0 %63, %v12_v0   ;;  %v90_v2 = vmov 1   ;;  %v57_v3 = vld [vmem:[%s132_s1] ss:$0 sm:$0xff]  ;;  %s91_s0 = smov [#allocation2]  }
   0x3   :  { %v58_v6 = vld [vmem:[%s132_s1 + $0x2] ss:$0 sm:$0xff]  ;;  %v59_v7 = vld [vmem:[%s132_s1 + $0x1] ss:$0 sm:$0xff]  ;;  %s49_s17 = sshll.u32 %s91_s0, 4  ;;  %vm41_vm0 = vcmask 392192   ;;  %s50_s17 = int_to_ptr.vmem [resolvable:$true] %s49_s17 }
   0x4   :  { %s65_s18 = scalar_lea.vmem %s50_s17, 128  ;;  %p70_p1 = scmp.lt.s32.totalorder %s50_s17, %s50_s17 }
   0x5   :  { %p66_p0 = scmp.ne.s32.totalorder %s50_s17, %s65_s18  ;;  %p71_p2 = scmp.lt.s32.totalorder %s65_s18, %s65_s18 }
   0x6   :  { %64 = vset.pattern.permute.xlu0 %v90_v2 }
   0x7   :  { %32 = vperm.xlu0 %64, %v12_v0   ;;  %p72_p3 = por %p71_p2, %p70_p1 }
   0x9   :  { %p73_p4 = pnand %p72_p3, %p66_p0 }
  0x81   :  { %v19_v4 = vpop.permute.xlu0 %18 }
  0x82   :  { %v25_v5 = vmul.f32 %v57_v3, %v19_v4 }
  0x84   :  { %v30_v9 = vadd.f32 %v58_v6, %v25_v5 }
  0x86   :  { %v33_v8 = vpop.permute.xlu0 %32 }
  0x87   :  { %v39_v10 = vmul.f32 %v59_v7, %v33_v8 }
  0x89   :  { %v40_v11 = vadd.f32 %v39_v10, %v30_v9 }
  0x8b   :  { %42 = vst.msk [vmem:[#allocation2] sm:$0xff] %vm41_vm0, %v40_v11 }
  0x8c   :  { %76 = shalt.err (!%p73_p4)
}
  0x8d   :  { %s77_s1 = scalar_lea.hbm %s133_s2, 128 }
  0x8e   :  { %p78_p5 = scmp.ne.s32.totalorder %s133_s2, %s77_s1  ;;  %p81_p6 = scmp.lt.u32.totalorder %s77_s1, %s133_s2 }
  0x90   :  { %p83_p7 = pnand %p81_p6, %p78_p5 }
  0x92   :  { %86 = shalt.err (!%p83_p7)
}
  0x93   :  { %52 = dma.vmem_to_hbm [thread:$0]  %s50_s17, 128, %s133_s2, [#allocation3]  }
  0x94   :  { %87 = dma.done.wait [#allocation3], 128  }
  0x95   :  { %88 = vsyncadd [#allocation3], 4294967168 }
  0x96   :  { %56 = vsyncpa [#allocation3], 1 }

</bundles_post_ra>
